<compile_context>
chip_gen: v7x
topology: tpu7x:2x2x1
jax: 0.10.0
libtpu: 0.0.40
codegen_flags: <defaults>
</compile_context>

<pallas_src>
import math
import functools

import jax
import jax.numpy as jnp
from jax import lax
from jax.experimental import pallas as pl
from jax.experimental.pallas import tpu as pltpu


def _performer_kernel(q_ref, k_ref, v_ref, w_ref, out_ref, vpad_ref, *,
                      c, c_pad, m, eps, ln_eps, mm_dtype):
    # q_ref/k_ref/v_ref: [bb, c, t] channel-major; w_ref: [m, c];
    # out_ref: [bb, 2c, t]; vpad_ref: [c_pad, t] persistent VMEM scratch (mm_dtype).
    bb, _, t = q_ref.shape
    inv_sqrt_m = 1.0 / math.sqrt(m)

    # Constant rows of the padded-v operand: row c = ones (kp_sum / D ones-row
    # trick), rows c+1..c_pad-1 = zeros.  Written once; scratch persists.
    @pl.when(pl.program_id(0) == 0)
    def _init_const_rows():
        rows = lax.broadcasted_iota(jnp.int32, (c_pad - c, t), 0)
        vpad_ref[c:, :] = jnp.where(rows == 0, 1.0, 0.0).astype(mm_dtype)

    w_mm = w_ref[...].astype(mm_dtype)                                    # [m, c]

    def prm_exp(x_f32):
        # exp(w @ x - |x|^2/2) / sqrt(m), channel-major -> [m, t] lane-dense on t.
        # Matmul operands in mm_dtype (MXU); exp and the reduction stay f32.
        xd = 0.5 * jnp.sum(x_f32 * x_f32, axis=0, keepdims=True)          # [1, t]
        wtx = jnp.dot(w_mm, x_f32.astype(mm_dtype),
                      preferred_element_type=jnp.float32)                 # [m, t]
        return jnp.exp(wtx - xd) * inv_sqrt_m

    def ln_rows(x):
        # torch.layer_norm over (h, w) == per-channel normalization over t, no affine.
        mean = jnp.mean(x, axis=-1, keepdims=True)
        xc = x - mean
        var = jnp.mean(xc * xc, axis=-1, keepdims=True)
        return xc * lax.rsqrt(var + ln_eps)

    contract_t = (((1,), (1,)), ((), ()))   # contract last dims, no batch dims

    for bi in range(bb):                    # static unroll over folded batches
        q = q_ref[bi].astype(jnp.float32)   # [c, t]
        k = k_ref[bi].astype(jnp.float32)   # [c, t]

        qp = prm_exp(q)                     # [m, t] f32
        kp = prm_exp(k)                     # [m, t] f32

        # Stage v (rows 0..c-1) next to the persistent ones/zeros rows.
        vpad_ref[0:c, :] = v_ref[bi].astype(mm_dtype)

        # Fused matmul #1: rows 0..c-1 -> kptv [c, m], row c -> kp_sum [1, m].
        kptv_full = lax.dot_general(vpad_ref[...], kp.astype(mm_dtype), contract_t,
                                    preferred_element_type=jnp.float32)   # [c_pad, m]
        # Fused matmul #2: rows 0..c-1 -> y numerator, row c -> D.
        num_full = jnp.dot(kptv_full.astype(mm_dtype), qp.astype(mm_dtype),
                           preferred_element_type=jnp.float32)            # [c_pad, t]

        d = num_full[c:c + 1, :]                                          # [1, t]
        y = num_full[0:c, :] * pl.reciprocal(d + eps, approx=True)        # [c, t]

        out_ref[bi, 0:c, :] = ln_rows(y).astype(out_ref.dtype)            # attention half
        out_ref[bi, c:2 * c, :] = ln_rows(q).astype(out_ref.dtype)        # residual half


def performer_forward(q_nchw, k_nchw, v_nchw, w_proj, *, epsilon=1e-8, ln_eps=1e-5,
                      matmul_dtype=jnp.bfloat16, out_dtype=jnp.float32,
                      batch_block=1):
    b, c, h, w = q_nchw.shape
    t = h * w
    m = w_proj.shape[0]
    assert w_proj.shape[1] == c, "emb (=in_dim*head_cnt) must equal channel count"
    assert b % batch_block == 0, "batch_block must divide the batch size"

    # Channel-major [b, c, t]: pure reshapes, no HBM-level transposes.
    q_bct = q_nchw.reshape(b, c, t)
    k_bct = k_nchw.reshape(b, c, t)
    v_bct = v_nchw.reshape(b, c, t)

    # Padded-v scratch rows: c data rows + 1 ones row, rounded up to the sublane
    # packing of the matmul dtype (16 for bf16, 8 for f32).  Pad rows are zeros.
    sub = 16 if jnp.dtype(matmul_dtype).itemsize == 2 else 8
    c_pad = ((c + 1 + sub - 1) // sub) * sub

    kernel = functools.partial(_performer_kernel, c=c, c_pad=c_pad, m=m,
                               eps=epsilon, ln_eps=ln_eps, mm_dtype=matmul_dtype)

    bb = batch_block
    out_bct2 = pl.pallas_call(
        kernel,
        out_shape=jax.ShapeDtypeStruct((b, 2 * c, t), out_dtype),
        grid_spec=pltpu.PrefetchScalarGridSpec(
            num_scalar_prefetch=0,
            grid=(b // bb,),                                     # parallel over batch groups
            in_specs=[
                pl.BlockSpec((bb, c, t), lambda i: (i, 0, 0)),   # q (also the residual)
                pl.BlockSpec((bb, c, t), lambda i: (i, 0, 0)),   # k
                pl.BlockSpec((bb, c, t), lambda i: (i, 0, 0)),   # v
                pl.BlockSpec((m, c), lambda i: (0, 0)),          # random-feature projection
            ],
            out_specs=pl.BlockSpec((bb, 2 * c, t), lambda i: (i, 0, 0)),
            scratch_shapes=[pltpu.VMEM((c_pad, t), matmul_dtype)],
        ),
        compiler_params=pltpu.CompilerParams(
            dimension_semantics=("parallel",),
        ),
    )(q_bct, k_bct, v_bct, w_proj)

    return out_bct2.reshape(b, 2 * c, h, w)


def make_projection(key, emb, kernel_ratio=0.5):
    """Deterministic stand-in for nn.init.orthogonal_(randn(m, emb)) * sqrt(m)."""
    m = int(emb * kernel_ratio)
    g = jax.random.normal(key, (emb, m), dtype=jnp.float32)
    qmat, _ = jnp.linalg.qr(g)          # [emb, m], orthonormal columns
    w = qmat.T * math.sqrt(m)           # [m, emb], orthonormal rows scaled by sqrt(m)
    return w.astype(jnp.float32)


def performer_reference(q, k, v, w_proj, epsilon=1e-8, ln_eps=1e-5):
    # Pure-JAX reference mirroring the PyTorch forward (f32 throughout).
    b, c, h, wd = q.shape
    t = h * wd
    m = w_proj.shape[0]

    def sc(x):
        return jnp.transpose(x.reshape(b, c, t), (0, 2, 1))

    def prm_exp(x):
        xd = jnp.sum(x * x, axis=-1, keepdims=True) / 2.0
        wtx = jnp.einsum("bti,mi->btm", x, w_proj)
        return jnp.exp(wtx - xd) / math.sqrt(m)

    qb, kb, vb = sc(q), sc(k), sc(v)
    kp, qp = prm_exp(kb), prm_exp(qb)
    D = jnp.einsum("bti,bi->bt", qp, kp.sum(axis=1))[:, :, None]
    kptv = jnp.einsum("bin,bim->bnm", vb, kp)
    y = jnp.einsum("bti,bni->btn", qp, kptv) / (D + epsilon)
    y = jnp.transpose(y, (0, 2, 1)).reshape(b, c, h, wd)
    out = jnp.concatenate([y, q], axis=1)
    mean = out.mean(axis=(-2, -1), keepdims=True)
    var = ((out - mean) ** 2).mean(axis=(-2, -1), keepdims=True)
    return (out - mean) * jax.lax.rsqrt(var + ln_eps)


if __name__ == "__main__":
    # dim is unused in the forward; emb = in_dim * head_cnt must equal channel count c.
    b, c, h, w = 2, 32, 16, 16
    kernel_ratio = 0.5

    key = jax.random.PRNGKey(0)
    kq, kk, kv, kw = jax.random.split(key, 4)
    q = jax.random.normal(kq, (b, c, h, w), dtype=jnp.float32)
    k = jax.random.normal(kk, (b, c, h, w), dtype=jnp.float32)
    v = jax.random.normal(kv, (b, c, h, w), dtype=jnp.float32)
    w_proj = make_projection(kw, c, kernel_ratio)   # [m, c] with m = 16

    ref = performer_reference(q, k, v, w_proj)

    # 1) Exact path (f32 matmul operands, f32 output), one batch per grid step:
    #    keeps two "parallel" steps for the two v7x TensorCores.  Tight tolerance;
    #    the only approximation left is the EUP approximate reciprocal on D.
    out = performer_forward(q, k, v, w_proj,
                            matmul_dtype=jnp.float32, out_dtype=jnp.float32)
    out = jax.block_until_ready(out)
    assert out.shape == (b, 2 * c, h, w)
    assert jnp.allclose(out, ref, atol=5e-3, rtol=5e-3), "f32 path mismatch vs reference"

    # 2) Production fast path: bf16 MXU operands + bf16 output.  bf16 rounding of
    #    the exp() argument and of the second-stage operands costs ~2-3 decimal
    #    digits (bf16 keeps f32's exponent range, so no overflow risk), hence the
    #    looser bound; the tight f32 check above carries the semantic validation.
    out_bf = performer_forward(q, k, v, w_proj,
                               matmul_dtype=jnp.bfloat16, out_dtype=jnp.bfloat16)
    out_bf = jax.block_until_ready(out_bf)
    assert jnp.allclose(out_bf.astype(jnp.float32), ref, atol=1.5e-1, rtol=1e-1), \
        "bf16 path mismatch vs reference"

    # 3) Batch-folded variant (whole batch in one grid step) — the single-TensorCore
    #    (v5e/v6e) configuration that amortizes per-grid-step overhead across b.
    out_fold = performer_forward(q, k, v, w_proj, matmul_dtype=jnp.float32,
                                 out_dtype=jnp.float32, batch_block=b)
    out_fold = jax.block_until_ready(out_fold)
    assert jnp.allclose(out_fold, ref, atol=5e-3, rtol=5e-3), "batch-folded mismatch"

    print("KERNEL_OK")
</pallas_src>

<mosaic_0001>
module attributes {stable_mosaic.version = 11 : i64} {
  func.func @_performer_kernel(%arg0: i32, %arg1: memref<1x32x256xf32, #tpu.memory_space<vmem>>, %arg2: memref<1x32x256xf32, #tpu.memory_space<vmem>>, %arg3: memref<1x32x256xf32, #tpu.memory_space<vmem>>, %arg4: memref<16x32xf32, #tpu.memory_space<vmem>>, %arg5: memref<1x64x256xf32, #tpu.memory_space<vmem>>, %arg6: memref<40x256xf32, #tpu.memory_space<vmem>>) attributes {dimension_semantics = [#tpu.dimension_semantics<parallel>], iteration_bounds = array<i64: 2>, scalar_prefetch = 0 : i64, scratch_operands = 1 : i64, tpu.core_type = #tpu.core_type<tc>, window_params = [{transform_indices = @transform_0, window_bounds = array<i64: 1, 32, 256>}, {transform_indices = @transform_1, window_bounds = array<i64: 1, 32, 256>}, {transform_indices = @transform_2, window_bounds = array<i64: 1, 32, 256>}, {pipeline_mode = #tpu.pipeline_mode<synchronous>, transform_indices = @transform_3, window_bounds = array<i64: 16, 32>}, {transform_indices = @transform_4, window_bounds = array<i64: 1, 64, 256>}]} {
    %c0_i32 = arith.constant 0 : i32
    %0 = arith.cmpi eq, %arg0, %c0_i32 : i32
    %1 = arith.extui %0 : i1 to i32
    %c0_i32_0 = arith.constant 0 : i32
    %2 = arith.cmpi ne, %1, %c0_i32_0 : i32
    scf.if %2 {
      %81 = tpu.iota {dimensions = array<i32: 0>} : vector<8x256xi32>
      %c0_i32_40 = arith.constant 0 : i32
      %82 = vector.broadcast %c0_i32_40 : i32 to vector<8x256xi32>
      %83 = arith.cmpi eq, %81, %82 : vector<8x256xi32>
      %cst_41 = arith.constant 1.000000e+00 : f32
      %cst_42 = arith.constant 0.000000e+00 : f32
      %84 = vector.broadcast %cst_41 : f32 to vector<8x256xf32>
      %85 = vector.broadcast %cst_42 : f32 to vector<8x256xf32>
      %86 = arith.select %83, %84, %85 : vector<8x256xi1>, vector<8x256xf32>
      %c32_43 = arith.constant 32 : index
      %c0_44 = arith.constant 0 : index
      %87 = vector.load %arg6[%c32_43, %c0_44] : memref<40x256xf32, #tpu.memory_space<vmem>>, vector<8x256xf32>
      tpu.vector_store %arg6[%c32_43, %c0_44], %86 {strides = array<i32>} : memref<40x256xf32, #tpu.memory_space<vmem>>, vector<8x256xf32>,
    } else {
    }
    %c0 = arith.constant 0 : index
    %c0_1 = arith.constant 0 : index
    %3 = vector.load %arg4[%c0, %c0_1] : memref<16x32xf32, #tpu.memory_space<vmem>>, vector<16x32xf32>
    %c0_2 = arith.constant 0 : index
    %c0_3 = arith.constant 0 : index
    %c0_4 = arith.constant 0 : index
    %4 = vector.load %arg1[%c0_2, %c0_3, %c0_4] : memref<1x32x256xf32, #tpu.memory_space<vmem>>, vector<1x32x256xf32>
    %5 = vector.shape_cast %4 : vector<1x32x256xf32> to vector<32x256xf32>
    %c0_5 = arith.constant 0 : index
    %c0_6 = arith.constant 0 : index
    %c0_7 = arith.constant 0 : index
    %6 = vector.load %arg2[%c0_5, %c0_6, %c0_7] : memref<1x32x256xf32, #tpu.memory_space<vmem>>, vector<1x32x256xf32>
    %7 = vector.shape_cast %6 : vector<1x32x256xf32> to vector<32x256xf32>
    %8 = arith.mulf %5, %5 : vector<32x256xf32>
    %cst = arith.constant dense<0.000000e+00> : vector<256xf32>
    %9 = vector.multi_reduction <add>, %8, %cst [0] : vector<32x256xf32> to vector<256xf32>
    %10 = vector.shape_cast %9 : vector<256xf32> to vector<1x256xf32>
    %cst_8 = arith.constant 5.000000e-01 : f32
    %11 = vector.broadcast %cst_8 : f32 to vector<1x256xf32>
    %12 = arith.mulf %11, %10 : vector<1x256xf32>
    %cst_9 = arith.constant dense<0.000000e+00> : vector<16x256xf32>
    %13 = tpu.matmul %3, %5, %cst_9 {dimension_numbers = #tpu.dot_dimension_numbers<[1], [0], [0], [1], [0, 0, 1, 1], [], []>} : vector<16x32xf32>, vector<32x256xf32>, vector<16x256xf32> -> vector<16x256xf32>
    %14 = vector.broadcast %12 : vector<1x256xf32> to vector<16x256xf32>
    %15 = arith.subf %13, %14 : vector<16x256xf32>
    %16 = math.exp %15 : vector<16x256xf32>
    %cst_10 = arith.constant 2.500000e-01 : f32
    %17 = vector.broadcast %cst_10 : f32 to vector<16x256xf32>
    %18 = arith.mulf %16, %17 : vector<16x256xf32>
    %19 = arith.mulf %7, %7 : vector<32x256xf32>
    %cst_11 = arith.constant dense<0.000000e+00> : vector<256xf32>
    %20 = vector.multi_reduction <add>, %19, %cst_11 [0] : vector<32x256xf32> to vector<256xf32>
    %21 = vector.shape_cast %20 : vector<256xf32> to vector<1x256xf32>
    %cst_12 = arith.constant 5.000000e-01 : f32
    %22 = vector.broadcast %cst_12 : f32 to vector<1x256xf32>
    %23 = arith.mulf %22, %21 : vector<1x256xf32>
    %cst_13 = arith.constant dense<0.000000e+00> : vector<16x256xf32>
    %24 = tpu.matmul %3, %7, %cst_13 {dimension_numbers = #tpu.dot_dimension_numbers<[1], [0], [0], [1], [0, 0, 1, 1], [], []>} : vector<16x32xf32>, vector<32x256xf32>, vector<16x256xf32> -> vector<16x256xf32>
    %25 = vector.broadcast %23 : vector<1x256xf32> to vector<16x256xf32>
    %26 = arith.subf %24, %25 : vector<16x256xf32>
    %27 = math.exp %26 : vector<16x256xf32>
    %cst_14 = arith.constant 2.500000e-01 : f32
    %28 = vector.broadcast %cst_14 : f32 to vector<16x256xf32>
    %29 = arith.mulf %27, %28 : vector<16x256xf32>
    %c0_15 = arith.constant 0 : index
    %c0_16 = arith.constant 0 : index
    %c0_17 = arith.constant 0 : index
    %30 = vector.load %arg3[%c0_15, %c0_16, %c0_17] : memref<1x32x256xf32, #tpu.memory_space<vmem>>, vector<1x32x256xf32>
    %31 = vector.shape_cast %30 : vector<1x32x256xf32> to vector<32x256xf32>
    %c0_18 = arith.constant 0 : index
    %c0_19 = arith.constant 0 : index
    %32 = vector.load %arg6[%c0_18, %c0_19] : memref<40x256xf32, #tpu.memory_space<vmem>>, vector<32x256xf32>
    tpu.vector_store %arg6[%c0_18, %c0_19], %31 {strides = array<i32>} : memref<40x256xf32, #tpu.memory_space<vmem>>, vector<32x256xf32>,
    %c0_20 = arith.constant 0 : index
    %c0_21 = arith.constant 0 : index
    %33 = vector.load %arg6[%c0_20, %c0_21] : memref<40x256xf32, #tpu.memory_space<vmem>>, vector<40x256xf32>
    %cst_22 = arith.constant dense<0.000000e+00> : vector<40x16xf32>
    %34 = tpu.matmul %33, %29, %cst_22 {dimension_numbers = #tpu.dot_dimension_numbers<[1], [1], [0], [0], [0, 0, 1, 0], [], []>} : vector<40x256xf32>, vector<16x256xf32>, vector<40x16xf32> -> vector<40x16xf32>
    %cst_23 = arith.constant dense<0.000000e+00> : vector<40x256xf32>
    %35 = tpu.matmul %34, %18, %cst_23 {dimension_numbers = #tpu.dot_dimension_numbers<[1], [0], [0], [1], [0, 0, 1, 1], [], []>} : vector<40x16xf32>, vector<16x256xf32>, vector<40x256xf32> -> vector<40x256xf32>
    %36 = vector.extract_strided_slice %35 {offsets = [32, 0], sizes = [1, 256], strides = [1, 1]} : vector<40x256xf32> to vector<1x256xf32>
    %37 = vector.extract_strided_slice %35 {offsets = [0, 0], sizes = [32, 256], strides = [1, 1]} : vector<40x256xf32> to vector<32x256xf32>
    %cst_24 = arith.constant 9.99999993E-9 : f32
    %38 = vector.broadcast %cst_24 : f32 to vector<1x256xf32>
    %39 = arith.addf %36, %38 : vector<1x256xf32>
    %40 = tpu.reciprocal %39 {approx = true} : vector<1x256xf32> -> vector<1x256xf32>
    %41 = vector.broadcast %40 : vector<1x256xf32> to vector<32x256xf32>
    %42 = arith.mulf %37, %41 : vector<32x256xf32>
    %cst_25 = arith.constant dense<0.000000e+00> : vector<32xf32>
    %43 = vector.multi_reduction <add>, %42, %cst_25 [1] : vector<32x256xf32> to vector<32xf32>
    %44 = vector.shape_cast %43 : vector<32xf32> to vector<32x1xf32>
    %cst_26 = arith.constant 2.560000e+02 : f32
    %45 = vector.broadcast %cst_26 : f32 to vector<32x1xf32>
    %46 = arith.divf %44, %45 : vector<32x1xf32>
    %47 = vector.broadcast %46 : vector<32x1xf32> to vector<32x256xf32>
    %48 = arith.subf %42, %47 : vector<32x256xf32>
    %49 = arith.mulf %48, %48 : vector<32x256xf32>
    %cst_27 = arith.constant dense<0.000000e+00> : vector<32xf32>
    %50 = vector.multi_reduction <add>, %49, %cst_27 [1] : vector<32x256xf32> to vector<32xf32>
    %51 = vector.shape_cast %50 : vector<32xf32> to vector<32x1xf32>
    %cst_28 = arith.constant 2.560000e+02 : f32
    %52 = vector.broadcast %cst_28 : f32 to vector<32x1xf32>
    %53 = arith.divf %51, %52 : vector<32x1xf32>
    %cst_29 = arith.constant 9.99999974E-6 : f32
    %54 = vector.broadcast %cst_29 : f32 to vector<32x1xf32>
    %55 = arith.addf %53, %54 : vector<32x1xf32>
    %56 = math.rsqrt %55 : vector<32x1xf32>
    %57 = vector.broadcast %56 : vector<32x1xf32> to vector<32x256xf32>
    %58 = arith.mulf %48, %57 : vector<32x256xf32>
    %c0_30 = arith.constant 0 : index
    %c0_31 = arith.constant 0 : index
    %c0_32 = arith.constant 0 : index
    %59 = vector.load %arg5[%c0_30, %c0_31, %c0_32] : memref<1x64x256xf32, #tpu.memory_space<vmem>>, vector<1x32x256xf32>
    %60 = vector.shape_cast %59 : vector<1x32x256xf32> to vector<32x256xf32>
    %61 = vector.shape_cast %58 : vector<32x256xf32> to vector<1x32x256xf32>
    tpu.vector_store %arg5[%c0_30, %c0_31, %c0_32], %61 {strides = array<i32>} : memref<1x64x256xf32, #tpu.memory_space<vmem>>, vector<1x32x256xf32>,
    %cst_33 = arith.constant dense<0.000000e+00> : vector<32xf32>
    %62 = vector.multi_reduction <add>, %5, %cst_33 [1] : vector<32x256xf32> to vector<32xf32>
    %63 = vector.shape_cast %62 : vector<32xf32> to vector<32x1xf32>
    %cst_34 = arith.constant 2.560000e+02 : f32
    %64 = vector.broadcast %cst_34 : f32 to vector<32x1xf32>
    %65 = arith.divf %63, %64 : vector<32x1xf32>
    %66 = vector.broadcast %65 : vector<32x1xf32> to vector<32x256xf32>
    %67 = arith.subf %5, %66 : vector<32x256xf32>
    %68 = arith.mulf %67, %67 : vector<32x256xf32>
    %cst_35 = arith.constant dense<0.000000e+00> : vector<32xf32>
    %69 = vector.multi_reduction <add>, %68, %cst_35 [1] : vector<32x256xf32> to vector<32xf32>
    %70 = vector.shape_cast %69 : vector<32xf32> to vector<32x1xf32>
    %cst_36 = arith.constant 2.560000e+02 : f32
    %71 = vector.broadcast %cst_36 : f32 to vector<32x1xf32>
    %72 = arith.divf %70, %71 : vector<32x1xf32>
    %cst_37 = arith.constant 9.99999974E-6 : f32
    %73 = vector.broadcast %cst_37 : f32 to vector<32x1xf32>
    %74 = arith.addf %72, %73 : vector<32x1xf32>
    %75 = math.rsqrt %74 : vector<32x1xf32>
    %76 = vector.broadcast %75 : vector<32x1xf32> to vector<32x256xf32>
    %77 = arith.mulf %67, %76 : vector<32x256xf32>
    %c0_38 = arith.constant 0 : index
    %c32 = arith.constant 32 : index
    %c0_39 = arith.constant 0 : index
    %78 = vector.load %arg5[%c0_38, %c32, %c0_39] : memref<1x64x256xf32, #tpu.memory_space<vmem>>, vector<1x32x256xf32>
    %79 = vector.shape_cast %78 : vector<1x32x256xf32> to vector<32x256xf32>
    %80 = vector.shape_cast %77 : vector<32x256xf32> to vector<1x32x256xf32>
    tpu.vector_store %arg5[%c0_38, %c32, %c0_39], %80 {strides = array<i32>} : memref<1x64x256xf32, #tpu.memory_space<vmem>>, vector<1x32x256xf32>,
    return
  }
  func.func @transform_0(%arg0: i32) -> (i32, i32, i32) {
    %c0_i32 = arith.constant 0 : i32
    %c0_i32_0 = arith.constant 0 : i32
    %c0_i32_1 = arith.constant 0 : i32
    return %arg0, %c0_i32, %c0_i32_0 : i32, i32, i32
  }
  func.func @transform_1(%arg0: i32) -> (i32, i32, i32) {
    %c0_i32 = arith.constant 0 : i32
    %c0_i32_0 = arith.constant 0 : i32
    %c0_i32_1 = arith.constant 0 : i32
    return %arg0, %c0_i32, %c0_i32_0 : i32, i32, i32
  }
  func.func @transform_2(%arg0: i32) -> (i32, i32, i32) {
    %c0_i32 = arith.constant 0 : i32
    %c0_i32_0 = arith.constant 0 : i32
    %c0_i32_1 = arith.constant 0 : i32
    return %arg0, %c0_i32, %c0_i32_0 : i32, i32, i32
  }
  func.func @transform_3(%arg0: i32) -> (i32, i32) {
    %c0_i32 = arith.constant 0 : i32
    %c0_i32_0 = arith.constant 0 : i32
    %c0_i32_1 = arith.constant 0 : i32
    return %c0_i32, %c0_i32_0 : i32, i32
  }
  func.func @transform_4(%arg0: i32) -> (i32, i32, i32) {
    %c0_i32 = arith.constant 0 : i32
    %c0_i32_0 = arith.constant 0 : i32
    %c0_i32_1 = arith.constant 0 : i32
    return %arg0, %c0_i32, %c0_i32_0 : i32, i32, i32
  }
}

</mosaic_0001>

<bundles_post_ra>
// kernel: tpu_custom_call.1
= control target key start
LH: loop header
LB: loop body
LE: loop exit
PB: predicated region body
PF: predicated region fallthrough
CT: control target
= control target key end

     0   :  { %s2042_s0 = inlined_call_operand.hbm [shape: f32[2,32,256], index: 0, kind: input, shape index: {}]   ;;  %s2043_s1 = inlined_call_operand.hbm [shape: f32[2,32,256], index: 1, kind: input, shape index: {}]   ;;  %s2044_s2 = inlined_call_operand.hbm [shape: f32[2,32,256], index: 2, kind: input, shape index: {}]   ;;  %s2045_s3 = inlined_call_operand.hbm [shape: f32[16,32], index: 3, kind: input, shape index: {}]   ;;  %s2046_s4 = inlined_call_operand.hbm [shape: f32[2,64,256], index: 4, kind: output, shape index: {}]  }
   0x1   :  { %2066 = sst [smem:[#allocation21_spill]] %s2043_s1 }
   0x2   :  { %9 = vsyncpa [#allocation4], 0 }
   0x3   :  { %11 = vsyncpa [#allocation4 + $0x1], 0 }
   0x4   :  { %12 = vsyncpa [#allocation7], 0 }
   0x5   :  { %14 = vsyncpa [#allocation7 + $0x1], 0 }
   0x6   :  { %15 = vsyncpa [#allocation10], 0 }
   0x7   :  { %16 = vsyncpa [#allocation5], 0 }
   0x8   :  { %18 = vsyncpa [#allocation5 + $0x1], 0  ;;  %s1522_s15 = smov 0   ;;  %s1524_s16 = smov 0  }
   0x9   :  { %s1526_s17 = smov 0   ;;  %s1528_s18 = smov 0  }
   0xa LB: > { %2067 = sst [smem:[#allocation16_spill]] %s1470_s15  ;;  %s1543_s19 = sadd.s32 1, %s1482_s18   ;;  %s1482_s18 = sphi %s1528_s18, %s2097_s18   ;;  %s1478_s17 = sphi %s1526_s17, %s2101_s17   ;;  %s1474_s16 = sphi %s1524_s16, %s2100_s16   ;;  %s1470_s15 = sphi %s1522_s15, %s2099_s15  }
   0xb   : > { %2068 = sst [smem:[#allocation17_spill]] %s1482_s18  ;;  %s31_s20 = sadd.s32 1, %s1478_s17 }
   0xc   : > { %2069 = sst [smem:[#allocation18_spill]] %s1543_s19  ;;  %s28_s21 = ssub.s32 %s1482_s18, %s1543_s19 }
   0xd   : > { %p2047_p0 = scmp.ne.s32.totalorder %s1478_s17, %s1474_s16  ;;  %p29_p1 = scmp.eq.s32.totalorder %s28_s21, 0 }
   0xe   : > { %p39_p2 = scmp.eq.s32.totalorder %s1482_s18, 0  ;;  %p1210_p4 = scmp.lt.s32.totalorder %s1482_s18, 2 }
   0xf   : > { %s1554_s22 = scalar_select %p29_p1, %s1478_s17, %s31_s20  }
  0x10   : > { %p40_p5 = por %p39_p2, %p2047_p0  ;;  %s2052_s23 = sand.u32 1, %s1478_s17  }
  0x11   : > { %2070 = sst [smem:[#allocation19_spill]] %s1554_s22  ;;  %s1562_s24 = sshll.u32 %s2052_s23, 6 }
  0x12   : > { %s1565_s25 = sshll.u32 %s1482_s18, 10  ;;  %p1567_p6 = pnand %p1210_p4, %p40_p5 }
  0x13   : > { %s201_s27 = sand.u32 1, %s1482_s18   ;;  %s2072_s1 = sld [smem:[#allocation21_spill]] }
  0x14   : > { %s2071_s26 = scalar_select %p1567_p6, 1, 0 }
  0x15   : > { %s205_s5 = scalar_lea.vmem [#allocation6], %s1562_s24  ;;  %s1581_s7 = scalar_lea.sflag [#allocation7], %s201_s27 }
  0x16   : > { %s212_s6 = sshll.u32 %s205_s5, 4  ;;  %p1587_p8 = pneg %p1567_p6  ;;  %s1579_s6 = int_to_ptr.vmem [resolvable:$true] %s212_s6 }
  0x18   : > { %s2073_s9 = scalar_select %p1587_p8, 1, 0 }
  0x19   : > { %s1576_s30 = scalar_lea.hbm %s2072_s1, %s1565_s25  ;;  %s1295_s12 = scalar_lea.hbm %s2072_s1, 2048 }
  0x1a   : > { %s1290_s8 = scalar_lea.hbm %s1576_s30, 1024  ;;  %p1296_p11 = scmp.lt.u32.totalorder %s1576_s30, %s2072_s1 }
  0x1b   : > { %p1291_p7 = scmp.ne.s32.totalorder %s1576_s30, %s1290_s8  ;;  %p1297_p12 = scmp.lt.u32.totalorder %s1295_s12, %s1290_s8 }
  0x1c   : > { %p1299_p1 = scmp.lt.u32.totalorder %s1290_s8, %s1576_s30 }
  0x1d   : > { %p1293_p9 = pnand %p1587_p8, %p1291_p7  ;;  %p1298_p13 = por %p1297_p12, %p1296_p11 }
  0x1f   : > { %p1294_p10 = pneg %p1293_p9  ;;  %p1300_p2 = por %p1299_p1, %p1298_p13 }
  0x21   : > { %p1301_p4 = pnand %p1300_p2, %p1294_p10 }
  0x23   : > { %1304 = shalt.err (!%p1301_p4)
}
  0x24   : > { %s1305_s20 = scalar_lea.vmem %s1579_s6, 1024  ;;  %s1484_s21 = smov [#allocation6]  }
  0x25   : > { %p1306_p5 = scmp.ne.s32.totalorder %s1579_s6, %s1305_s20  ;;  %s1310_s27 = sshll.u32 %s1484_s21, 4  ;;  %s1311_s27 = int_to_ptr.vmem [resolvable:$false] %s1310_s27 }
  0x26   : > { %s1312_s28 = scalar_lea.vmem %s1311_s27, 2048  ;;  %p1313_p3 = scmp.lt.s32.totalorder %s1579_s6, %s1311_s27 }
  0x27   : > { %p1308_p7 = pnand %p1306_p5, %p1587_p8  ;;  %p1314_p0 = scmp.lt.s32.totalorder %s1312_s28, %s1305_s20 }
  0x29   : > { %p1309_p9 = pneg %p1308_p7  ;;  %p1315_p11 = por %p1314_p0, %p1313_p3 }
  0x2b   : > { %p1316_p12 = pnand %p1315_p11, %p1309_p9 }
  0x2d   : > { %1319 = shalt.err (!%p1316_p12)
}
  0x2e   : > { %s2048_s29 = smov 256   ;;  %s2050_s5 = smov 16  }
  0x2f   : > { %1201 = dma.hbm_to_vmem [thread:$0]  (!%p1567_p6), %s1576_s30, 1024, %s1579_s6, %s1581_s7, %s2048_s29, %s2048_s29, %s2050_s5  }
  0x30   : > { %s1615_s8 = sadd.s32 4294967295, %s1482_s18   ;;  %s1117_s10 = sadd.s32 4294967294, %s1482_s18  }
  0x31   : > { %p44_p0 = scmp.ne.s32.totalorder %s1474_s16, %s1470_s15  ;;  %p2056_p3 = scmp.eq.s32.totalorder %s1615_s8, 0 }
  0x32   : > { %p141_p10 = scmp.eq.s32.totalorder %s1615_s8, 1  ;;  %p147_p13 = scmp.eq.s32.totalorder %s1117_s10, 1 }
  0x33   : > { %p1624_p1 = por %p2056_p3, %p44_p0  ;;  %p1118_p2 = scmp.ge.s32.totalorder %s1482_s18, 1 }
  0x34   : > { %p2075_p4 = scmp.ne.s32.totalorder %s1478_s17, %s1474_s16  ;;  %p1636_p7 = por %p147_p13, %p44_p0 }
  0x35   : > { %s2074_s11 = scalar_select %p1624_p1, 1, 0 }
  0x36   : > { %p1632_p5 = por %p141_p10, %p2075_p4  ;;  %p154_p9 = scmp.lt.s32.totalorder %s1482_s18, 3 }
  0x37   : > { %s2077_s6 = scalar_select %p1636_p7, 1, 0 }
  0x38   : > { %s2076_s30 = scalar_select %p1632_p5, 1, 0 }
  0x39   : > { %2078 = sst [smem:[#allocation20_spill]] %s2077_s6  ;;  %p1642_p12 = pnand %p1118_p2, %p154_p9 }
  0x3a   : > { %s1487_s13 = smov [#allocation9]   ;;  %s1654_s27 = scalar_lea.hbm %s2042_s0, %s1565_s25 }
  0x3b   : > { %s2079_s12 = scalar_select %p1642_p12, 1, 0 }
  0x3c   : > { %s166_s14 = sshll.u32 %s1487_s13, 4  ;;  %p1191_p10 = pneg %p1642_p12  ;;  %s1646_s14 = int_to_ptr.vmem [resolvable:$true] %s166_s14 }
  0x3d   : > { %s184_s10 = scalar_lea.vmem [#allocation3], %s1562_s24  ;;  %s1669_s23 = scalar_lea.hbm %s2044_s2, %s1565_s25 }
  0x3e   : > { %p1658_p0 = pnand %p1191_p10, %p2056_p3  ;;  %s191_s29 = sshll.u32 %s184_s10, 4  ;;  %s1663_s29 = int_to_ptr.vmem [resolvable:$true] %s191_s29 }
  0x3f   : > { %s1320_s20 = scalar_lea.hbm %s2045_s3, 256 }
  0x40   : > { %p1321_p13 = scmp.ne.s32.totalorder %s2045_s3, %s1320_s20  ;;  %p1322_p2 = pneg %p1658_p0 }
  0x41   : > { %p1327_p10 = scmp.lt.u32.totalorder %s1320_s20, %s2045_s3 }
  0x42   : > { %p1323_p4 = pnand %p1322_p2, %p1321_p13 }
  0x44   : > { %p1324_p9 = pneg %p1323_p4 }
  0x46   : > { %p1329_p11 = pnand %p1327_p10, %p1324_p9 }
  0x48   : > { %1332 = shalt.err (!%p1329_p11)
}
  0x49   : > { %s1333_s25 = scalar_lea.vmem %s1646_s14, 256  ;;  %p1341_p1 = scmp.lt.s32.totalorder %s1646_s14, %s1646_s14 }
  0x4a   : > { %p1334_p3 = scmp.ne.s32.totalorder %s1646_s14, %s1333_s25  ;;  %p1342_p12 = scmp.lt.s32.totalorder %s1333_s25, %s1333_s25 }
  0x4c   : > { %p1336_p7 = pnand %p1334_p3, %p1322_p2  ;;  %p1343_p6 = por %p1342_p12, %p1341_p1 }
  0x4e   : > { %p1337_p5 = pneg %p1336_p7 }
  0x50   : > { %p1344_p8 = pnand %p1343_p6, %p1337_p5 }
  0x52   : > { %1347 = shalt.err (!%p1344_p8)
}
  0x53   : > { %s1488_s1 = smov 128   ;;  %s1489_s18 = smov 8  }
  0x54   : > { %1194 = dma.hbm_to_vmem [thread:$0]  (!%p1658_p0), %s2045_s3, 256, %s1646_s14, [#allocation10], %s1488_s1, %s1488_s1, %s1489_s18  }
  0x55   : > { %s2081_s5 = sand.u32 1, %s1478_s17   ;;  %s1348_s20 = scalar_lea.hbm %s1654_s27, 1024 }
  0x56   : > { %s1694_s13 = scalar_lea.sflag [#allocation4], %s2081_s5  ;;  %p1349_p6 = scmp.ne.s32.totalorder %s1654_s27, %s1348_s20 }
  0x57   : > { %p2082_p8 = scmp.ne.s32.totalorder %s2073_s9, 0  ;;  %s1353_s25 = scalar_lea.hbm %s2042_s0, 2048 }
  0x58   : > { %p1354_p5 = scmp.lt.u32.totalorder %s1654_s27, %s2042_s0  ;;  %p1355_p7 = scmp.lt.u32.totalorder %s1353_s25, %s1348_s20 }
  0x59   : > { %p1351_p3 = pnand %p1349_p6, %p2082_p8  ;;  %p1357_p12 = scmp.lt.u32.totalorder %s1348_s20, %s1654_s27 }
  0x5a   : > { %p1356_p11 = por %p1355_p7, %p1354_p5 }
  0x5b   : > { %p1352_p1 = pneg %p1351_p3 }
  0x5c   : > { %p1358_p0 = por %p1357_p12, %p1356_p11 }
  0x5e   : > { %p1359_p13 = pnand %p1358_p0, %p1352_p1 }
  0x60   : > { %1362 = shalt.err (!%p1359_p13)
}
  0x61   : > { %s1363_s14 = scalar_lea.vmem %s1663_s29, 1024  ;;  %s1490_s28 = smov [#allocation3]  }
  0x62   : > { %p1364_p2 = scmp.ne.s32.totalorder %s1663_s29, %s1363_s14  ;;  %s1368_s1 = sshll.u32 %s1490_s28, 4  ;;  %s1369_s1 = int_to_ptr.vmem [resolvable:$false] %s1368_s1 }
  0x63   : > { %s1370_s15 = scalar_lea.vmem %s1369_s1, 2048  ;;  %p1371_p10 = scmp.lt.s32.totalorder %s1663_s29, %s1369_s1 }
  0x64   : > { %p1366_p4 = pnand %p1364_p2, %p2082_p8  ;;  %p1372_p6 = scmp.lt.s32.totalorder %s1370_s15, %s1363_s14 }
  0x66   : > { %p1367_p9 = pneg %p1366_p4  ;;  %p1373_p3 = por %p1372_p6, %p1371_p10 }
  0x68   : > { %p1374_p5 = pnand %p1373_p3, %p1367_p9 }
  0x6a   : > { %1377 = shalt.err (!%p1374_p5)
}
  0x6b   : > { %p2083_p1 = scmp.ne.s32.totalorder %s2071_s26, 0  ;;  %s2084_s6 = smov 16  }
  0x6c   : > { %s2085_s18 = smov 256   ;;  %s226_s19 = scalar_lea.vmem [#allocation8], %s1562_s24 }
  0x6d   : > { %1198 = dma.hbm_to_vmem [thread:$0]  (!%p2083_p1), %s1654_s27, 1024, %s1663_s29, %s1694_s13, %s2085_s18, %s2085_s18, %s2084_s6  }
  0x6e   : > { %s233_s22 = sshll.u32 %s226_s19, 4  ;;  %s1378_s5 = scalar_lea.hbm %s1669_s23, 1024  ;;  %s1722_s22 = int_to_ptr.vmem [resolvable:$true] %s233_s22 }
  0x6f   : > { %p1379_p7 = scmp.ne.s32.totalorder %s1669_s23, %s1378_s5  ;;  %s1383_s10 = scalar_lea.hbm %s2044_s2, 2048 }
  0x70   : > { %p1384_p0 = scmp.lt.u32.totalorder %s1669_s23, %s2044_s2  ;;  %p1385_p13 = scmp.lt.u32.totalorder %s1383_s10, %s1378_s5 }
  0x71   : > { %p1381_p11 = pnand %p1379_p7, %p2082_p8  ;;  %p1387_p4 = scmp.lt.u32.totalorder %s1378_s5, %s1669_s23 }
  0x72   : > { %p1386_p2 = por %p1385_p13, %p1384_p0 }
  0x73   : > { %p1382_p12 = pneg %p1381_p11 }
  0x74   : > { %p1388_p9 = por %p1387_p4, %p1386_p2 }
  0x76   : > { %p1389_p10 = pnand %p1388_p9, %p1382_p12 }
  0x78   : > { %1392 = shalt.err (!%p1389_p10)
}
  0x79   : > { %s1393_s24 = scalar_lea.vmem %s1722_s22, 1024  ;;  %s1491_s29 = smov [#allocation8]  }
  0x7a   : > { %p1394_p6 = scmp.ne.s32.totalorder %s1722_s22, %s1393_s24  ;;  %s1398_s27 = sshll.u32 %s1491_s29, 4  ;;  %s1399_s27 = int_to_ptr.vmem [resolvable:$false] %s1398_s27 }
  0x7b   : > { %s1400_s13 = scalar_lea.vmem %s1399_s27, 2048  ;;  %p1401_p7 = scmp.lt.s32.totalorder %s1722_s22, %s1399_s27 }
  0x7c   : > { %p1396_p3 = pnand %p1394_p6, %p2082_p8  ;;  %p1402_p11 = scmp.lt.s32.totalorder %s1400_s13, %s1393_s24 }
  0x7e   : > { %p1397_p5 = pneg %p1396_p3  ;;  %p1403_p0 = por %p1402_p11, %p1401_p7 }
  0x80   : > { %p1404_p13 = pnand %p1403_p0, %p1397_p5 }
  0x82   : > { %1407 = shalt.err (!%p1404_p13)
}
  0x83   : > { %1204 = dma.hbm_to_vmem [thread:$0]  (!%p2083_p1), %s1669_s23, 1024, %s1722_s22, %s1581_s7, %s2085_s18, %s2085_s18, %s2084_s6  }
  0x84   : > { %p2086_p8 = scmp.ne.s32.totalorder %s2079_s12, 0 }
  0x85   : > { %s1752_s9 = sand.u32 (!%p2086_p8), 1, %s1474_s16   ;;  %p2087_p12 = scmp.ne.s32.totalorder (!%p2086_p8), %s2074_s11, 0 }
  0x86   : > { %245 = sbr.rel (%p2086_p8) target bundleno = 1209 (0x4b9), region = 36  ;;  %s1131_s28 = sshll.u32 (!%p2086_p8), %s1752_s9, 6 }
  0x87   : > { %s248_s1 = scalar_lea.sflag (!%p2086_p8), [#allocation4], %s1752_s9  ;;  %s1756_s15 = scalar_lea.vmem (!%p2086_p8), [#allocation3], %s1131_s28 }
  0x8d   : > { %1453 = dma.done.wait (%p2087_p12), %s248_s1, 1024  }
  0x8e   : > { %1455 = vsyncadd (%p2087_p12), %s248_s1, 4294966272  ;;  %s256_s23 = sand.u32 1, %s1615_s8   ;;  %s1763_s7 = scalar_lea.vmem [#allocation6], %s1131_s28 }
  0x8f   : > { %s257_s26 = scalar_lea.sflag [#allocation7], %s256_s23 }
  0x90   : > { %1457 = dma.done.wait (%p2087_p12), %s257_s26, 2048  }
  0x91   : > { %1459 = vsyncadd (%p2087_p12), %s257_s26, 4294965248  ;;  %s1769_s12 = scalar_lea.vmem [#allocation8], %s1131_s28  ;;  %p2088_p1 = scmp.eq.s32.totalorder %s1615_s8, 0 }
  0x93   : > { %1461 = dma.done.wait (%p2088_p1), [#allocation10], 256   ;;  %p2089_p2 = pmov %p2088_p1 }
  0x94   : > { %s1135_s6 = sshll.u32 %s1752_s9, 7  ;;  %p2090_p4 = scmp.ne.s32.totalorder %s1615_s8, 0 }
  0x95   : > { %1463 = vsyncadd (%p2089_p2), [#allocation10], 4294967040  ;;  %s1776_s18 = scalar_lea.vmem [#allocation11], %s1135_s6  ;;  %v312_v0 = vlaneseq (!%p2090_p4)  ;;  %v1492_v2 = vmov (!%p2090_p4), 0.0  }
  0x96   : > { %311 = sbr.rel (%p2090_p4) target bundleno = 157 (0x9d), region = 56 }
  0x97   : > { %v313_v1 = vshrl.u32 (!%p2090_p4), %v312_v0, 7 }
  0x99   : > { %vm314_vm0 = vcmp.eq.s32.totalorder (!%p2090_p4), %v313_v1, 0 }
  0x9a   : > { %v315_v3 = vsel (!%p2090_p4), %vm314_vm0, 1.0, %v1492_v2 }
  0x9b   : > { %316 = vst [vmem:[#allocation2 + $0x40] sm:$0xff] (!%p2090_p4), %v315_v3  ;;  %317 = vst [vmem:[#allocation2 + $0x48] sm:$0xff] (!%p2090_p4), %v315_v3 }
  0x9d PF: > { %v329_v4 = vld [vmem:[%s1763_s7 + $0x8] sm:$0xff]  ;;  %v331_v5 = vld [vmem:[%s1763_s7 + $0x18] sm:$0xff]  ;;  %v328_v6 = vld [vmem:[%s1763_s7] sm:$0xff]  ;;  %v1493_v14 = vmov 0.0   ;;  %vm364_vm1 = vcmask 261120   ;;  %vm701_vm2 = vcmask 130048  }
  0x9e   : > { %v465_v7 = vmul.f32 %v329_v4, %v329_v4  ;;  %v467_v8 = vmul.f32 %v331_v5, %v331_v5  ;;  %v1163_v9 = vpack.c.bf16 %v331_v5, %v329_v4  ;;  %v330_v10 = vld [vmem:[%s1763_s7 + $0x10] sm:$0xff]  ;;  %v464_v11 = vmul.f32 %v328_v6, %v328_v6  ;;  %v333_v12 = vld [vmem:[%s1763_s7 + $0x28] sm:$0xff]  ;;  %v335_v13 = vld [vmem:[%s1763_s7 + $0x38] sm:$0xff]  ;;  %556 = vmatprep.mubr.f32.mxu1 %v1493_v14  ;;  %s1154_s11 = sshll.u32 %s1615_s8, 11  ;;  %s991_s19 = sshll.u32 %s1776_s18, 4  ;;  %s1994_s19 = int_to_ptr.vmem [resolvable:$true] %s991_s19 }
  0x9f   : > { %v466_v15 = vmul.f32 %v330_v10, %v330_v10  ;;  %v1165_v16 = vpack.c.bf16 %v330_v10, %v328_v6  ;;  %v469_v17 = vmul.f32 %v333_v12, %v333_v12  ;;  %v332_v18 = vld [vmem:[%s1763_s7 + $0x20] sm:$0xff]  ;;  %v334_v19 = vld [vmem:[%s1763_s7 + $0x30] sm:$0xff]  ;;  %435 = vmatprep.mubr.f32.mxu0 %v1493_v14  ;;  %v471_v21 = vmul.f32 %v335_v13, %v335_v13  ;;  %v1791_v24 = vld [vmem:[%s1756_s15 + $0x8] sm:$0xff]  ;;  %s1992_s20 = scalar_lea.hbm %s2046_s4, %s1154_s11  ;;  %s978_s8 = scalar_lea.sflag [#allocation5], %s1752_s9 }
  0xa0   : > { %v481_v20 = vadd.f32 %v467_v8, %v465_v7  ;;  %1164 = vmatprep.subr.bf16.mxu1 %v1163_v9  ;;  %v1167_v22 = vpack.c.bf16 %v335_v13, %v333_v12  ;;  %v468_v23 = vmul.f32 %v332_v18, %v332_v18  ;;  %v1794_v25 = vld [vmem:[%s1756_s15 + $0x18] sm:$0xff]  ;;  %v470_v27 = vmul.f32 %v334_v19, %v334_v19  ;;  %v1797_v29 = vld [vmem:[%s1756_s15] sm:$0xff]  ;;  %v1800_v30 = vld [vmem:[%s1756_s15 + $0x10] sm:$0xff]  ;;  %s1408_s21 = scalar_lea.vmem %s1994_s19, 2048  ;;  %p2091_p10 = scmp.ne.s32.totalorder %s2076_s30, 0 }
  0xa1   : > { %v472_v26 = vadd.f32 %v466_v15, %v464_v11  ;;  %1166 = vmatpush1.bf16.msra.mxu1 %v1165_v16  ;;  %v1169_v28 = vpack.c.bf16 %v334_v19, %v332_v18  ;;  %v1803_v31 = vld [vmem:[%s1756_s15 + $0x28] sm:$0xff]  ;;  %v1155_v33 = vpack.c.bf16 %v1794_v25, %v1791_v24  ;;  %v1808_v34 = vld [vmem:[%s1756_s15 + $0x38] sm:$0xff]  ;;  %v1811_v35 = vld [vmem:[%s1756_s15 + $0x20] sm:$0xff]  ;;  %v1157_v38 = vpack.c.bf16 %v1800_v30, %v1797_v29  ;;  %p1409_p9 = scmp.ne.s32.totalorder %s1994_s19, %s1408_s21  ;;  %s1494_s10 = smov [#allocation11]  }
  0xa2   : > { %v482_v32 = vadd.f32 %v481_v20, %v469_v17  ;;  %1168 = vmatprep.subr.bf16.mxu1 %v1167_v22  ;;  %v1814_v36 = vld [vmem:[%s1756_s15 + $0x30] sm:$0xff]  ;;  %v1159_v40 = vpack.c.bf16 %v1808_v34, %v1803_v31  ;;  %v318_v42 = vld [vmem:[#allocation9] sm:$0xff]  ;;  %v319_v44 = vld [vmem:[#allocation9 + $0x8] sm:$0xff]  ;;  %v336_v53 = vmul.f32 %v1797_v29, %v1797_v29  ;;  %v338_v54 = vmul.f32 %v1800_v30, %v1800_v30  ;;  %s1412_s25 = sshll.u32 %s1494_s10, 4  ;;  %s1413_s25 = int_to_ptr.vmem [resolvable:$false] %s1412_s25 }
  0xa3   : > { %v473_v37 = vadd.f32 %v472_v26, %v468_v23  ;;  %1156 = vmatprep.subr.bf16.mxu0 %v1155_v33  ;;  %v1161_v43 = vpack.c.bf16 %v1814_v36, %v1811_v35  ;;  %v586_v45 = vld [vmem:[%s1769_s12 + $0x8] sm:$0xff]  ;;  %v1827_v46 = vld [vmem:[%s1769_s12] sm:$0xff]  ;;  %v1830_v47 = vld [vmem:[%s1769_s12 + $0x18] sm:$0xff]  ;;  %v337_v55 = vmul.f32 %v1791_v24, %v1791_v24  ;;  %v339_v56 = vmul.f32 %v1794_v25, %v1794_v25  ;;  %p1410_p6 = pnand %p1409_p9, %p2091_p10  ;;  %s1414_s14 = scalar_lea.vmem %s1413_s25, 4096 }
  0xa4   : > { %v483_v39 = vadd.f32 %v482_v32, %v471_v21  ;;  %1158 = vmatpush1.bf16.msra.mxu0 %v1157_v38  ;;  %v1833_v48 = vld [vmem:[%s1769_s12 + $0x10] sm:$0xff]  ;;  %v1836_v49 = vld [vmem:[%s1769_s12 + $0x28] sm:$0xff]  ;;  %v1839_v50 = vld [vmem:[%s1769_s12 + $0x20] sm:$0xff]  ;;  %v344_v57 = vadd.f32 %v338_v54, %v336_v53  ;;  %v340_v58 = vmul.f32 %v1811_v35, %v1811_v35  ;;  %v341_v60 = vmul.f32 %v1803_v31, %v1803_v31  ;;  %p1415_p5 = scmp.lt.s32.totalorder %s1994_s19, %s1413_s25  ;;  %p1416_p7 = scmp.lt.s32.totalorder %s1414_s14, %s1408_s21 }
  0xa5   : > { %v474_v41 = vadd.f32 %v473_v37, %v470_v27  ;;  %1170 = vmatpush1.bf16.msra.mxu1 %v1169_v28  ;;  %1160 = vmatprep.subr.bf16.mxu0 %v1159_v40  ;;  %v1842_v51 = vld [vmem:[%s1769_s12 + $0x38] sm:$0xff]  ;;  %v1845_v52 = vld [vmem:[%s1769_s12 + $0x30] sm:$0xff]  ;;  %v353_v59 = vadd.f32 %v339_v56, %v337_v55  ;;  %v342_v61 = vmul.f32 %v1814_v36, %v1814_v36  ;;  %p1411_p3 = pneg %p1410_p6 }
  0xa6   : > { %v345_v62 = vadd.f32 %v344_v57, %v340_v58  ;;  %v343_v63 = vmul.f32 %v1808_v34, %v1808_v34  ;;  %v484_v3 = vrot.slane %v483_v39, 4  ;;  %p1417_p11 = por %p1416_p7, %p1415_p5 }
  0xa7   : > { %v354_v0 = vadd.f32 %v353_v59, %v341_v60  ;;  %v475_v1 = vrot.slane %v474_v41, 4 }
  0xa8   : > { %1139 = vmatmul.mubr.msk.f32.vlgmr.msra.gmra.mrb[0].mxu1 %vm364_vm1, %v318_v42  ;;  %1162 = vmatpush1.bf16.msra.mxu0 %v1161_v43  ;;  %v346_v2 = vadd.f32 %v345_v62, %v342_v61  ;;  %v485_v7 = vadd.f32 %v484_v3, %v483_v39  ;;  %p1418_p0 = pnand %p1417_p11, %p1411_p3 }
  0xa9   : > { %562 = vmatprep.mubr.f32.mxu1 %v1493_v14  ;;  %v355_v4 = vadd.f32 %v354_v0, %v343_v63  ;;  %v476_v5 = vadd.f32 %v475_v1, %v474_v41 }
  0xaa   : > { %v347_v6 = vrot.slane %v346_v2, 4  ;;  %v486_v11 = vrot.slane %v485_v7, 2 }
  0xab   : > { %1137 = vmatmul.mubr.msk.f32.vlgmr.msra.gmra.mrb[0].mxu0 %vm364_vm1, %v318_v42  ;;  %v356_v8 = vrot.slane %v355_v4, 4  ;;  %v477_v9 = vrot.slane %v476_v5, 2 }
  0xac   : > { %1140 = vmatmul.mubr.msk.f32.gmra.mrb[2].mxu1 %vm364_vm1, %v319_v44  ;;  %441 = vmatprep.mubr.f32.mxu0 %v1493_v14  ;;  %v348_v10 = vadd.f32 %v347_v6, %v346_v2  ;;  %v487_v16 = vadd.f32 %v486_v11, %v485_v7 }
  0xad   : > { %781 = vmatprep.mubr.f32.mxu1 %v1493_v14  ;;  %v357_v12 = vadd.f32 %v356_v8, %v355_v4  ;;  %v478_v13 = vadd.f32 %v477_v9, %v476_v5 }
  0xae   : > { %v349_v15 = vrot.slane %v348_v10, 2  ;;  %v488_v20 = vrot.slane %v487_v16, 1 }
  0xaf   : > { %1138 = vmatmul.mubr.msk.f32.gmra.mrb[2].mxu0 %vm364_vm1, %v319_v44  ;;  %v358_v17 = vrot.slane %v357_v12, 2  ;;  %v479_v18 = vrot.slane %v478_v13, 1 }
  0xb0   : > { %675 = vmatprep.mubr.f32.mxu0 %v586_v45  ;;  %v350_v19 = vadd.f32 %v349_v15, %v348_v10  ;;  %v489_v26 = vadd.f32 %v488_v20, %v487_v16 }
  0xb1   : > { %v359_v21 = vadd.f32 %v358_v17, %v357_v12  ;;  %v480_v22 = vadd.f32 %v479_v18, %v478_v13 }
  0xb2   : > { %v351_v23 = vrot.slane %v350_v19, 1  ;;  %v491_v33 = vmul.f32 0.5, %v489_v26 }
  0xb3   : > { %v360_v27 = vrot.slane %v359_v21, 1  ;;  %v490_v28 = vmul.f32 0.5, %v480_v22 }
  0xb4   : > { %v352_v32 = vadd.f32 %v351_v23, %v350_v19 }
  0xb5   : > { %v361_v37 = vadd.f32 %v360_v27, %v359_v21 }
  0xb6   : > { %v362_v41 = vmul.f32 0.5, %v352_v32 }
  0xb7   : > { %v363_v43 = vmul.f32 0.5, %v361_v37  ;;  %v609_v37 = vld [vmem:[#allocation2 + $0x40] sm:$0xff] }
 0x17b   : > { %v558_v38 = vpop.f32.mrb[0].mxu1 }
 0x17c   : > { %v569_v39 = vsub.f32 %v558_v38, %v490_v28  ;;  %v560_v40 = vpop.f32.mrb[1].mxu1  ;;  %v908_v38 = vadd.f32 %v1794_v25, %v1800_v30 }
 0x17d   : > { %v570_v42 = vsub.f32 %v560_v40, %v491_v33 }
 0x17e   : > { %v573_v44 = vmul.f32 1.442695, %v569_v39  ;;  %v437_v54 = vpop.f32.mrb[0].mxu0  ;;  %909 = vadd.xlane.f32.xlu1 %v908_v38 }
 0x17f   : > { %v575_v45 = vmul.f32 1.442695, %v570_v42  ;;  %v564_v53 = vpop.f32.mrb[2].mxu1  ;;  %v448_v57 = vsub.f32 %v437_v54, %v362_v41  ;;  %v439_v58 = vpop.f32.mrb[1].mxu0 }
 0x180   : > { %v571_v55 = vsub.f32 %v564_v53, %v490_v28  ;;  %v566_v56 = vpop.f32.mrb[3].mxu1  ;;  %v449_v60 = vsub.f32 %v439_v58, %v363_v43  ;;  %1254 = vpow2.f32 %v573_v44 }
 0x181   : > { %v572_v59 = vsub.f32 %v566_v56, %v491_v33  ;;  %v452_v62 = vmul.f32 1.442695, %v448_v57  ;;  %1256 = vpow2.f32 %v575_v45  ;;  %v610_v33 = vld [vmem:[#allocation2 + $0x48] sm:$0xff] }
 0x182   : > { %v577_v61 = vmul.f32 1.442695, %v571_v55  ;;  %v454_v0 = vmul.f32 1.442695, %v449_v60  ;;  %v443_v1 = vpop.f32.mrb[2].mxu0 }
 0x183   : > { %v579_v63 = vmul.f32 1.442695, %v572_v59  ;;  %v450_v2 = vsub.f32 %v443_v1, %v362_v41  ;;  %v445_v3 = vpop.f32.mrb[3].mxu0 }
 0x184   : > { %1258 = vpow2.f32 %v577_v61  ;;  %v451_v4 = vsub.f32 %v445_v3, %v363_v43 }
 0x185   : > { %1260 = vpow2.f32 %v579_v63  ;;  %v456_v5 = vmul.f32 1.442695, %v450_v2 }
 0x186   : > { %1262 = vpow2.f32 %v452_v62  ;;  %v458_v6 = vmul.f32 1.442695, %v451_v4  ;;  %v816_v62 = vlaneseq }
 0x187   : > { %1264 = vpow2.f32 %v454_v0 }
 0x188   : > { %1266 = vpow2.f32 %v456_v5 }
 0x189   : > { %1268 = vpow2.f32 %v458_v6 }
 0x18a   : > { %v1255_v7 = vpop.eup %1254 }
 0x18b   : > { %v1257_v8 = vpop.eup %1256  ;;  %v581_v11 = vmul.f32 0.25, %v1255_v7 }
 0x18c   : > { %v582_v15 = vmul.f32 0.25, %v1257_v8 }
 0x18e   : > { %v1259_v9 = vpop.eup %1258 }
 0x18f   : > { %v1261_v10 = vpop.eup %1260  ;;  %v583_v12 = vmul.f32 0.25, %v1259_v9 }
 0x190   : > { %v1263_v13 = vpop.eup %1262  ;;  %v584_v16 = vmul.f32 0.25, %v1261_v10 }
 0x191   : > { %v1265_v17 = vpop.eup %1264  ;;  %v1173_v18 = vpack.c.bf16 %v583_v12, %v581_v11  ;;  %v460_v19 = vmul.f32 0.25, %v1263_v13 }
 0x192   : > { %v1267_v20 = vpop.eup %1266  ;;  %v1171_v21 = vpack.c.bf16 %v584_v16, %v582_v15  ;;  %v461_v22 = vmul.f32 0.25, %v1265_v17 }
 0x193   : > { %v1269_v23 = vpop.eup %1268  ;;  %v462_v26 = vmul.f32 0.25, %v1267_v20 }
 0x194   : > { %1172 = vmatprep.subr.bf16.mxu0 %v1171_v21  ;;  %v463_v27 = vmul.f32 0.25, %v1269_v23 }
 0x195   : > { %1174 = vmatpush1.bf16.xpose.msra.mxu0 %v1173_v18  ;;  %v1177_v28 = vpack.c.bf16 %v462_v26, %v460_v19 }
 0x196   : > { %v1175_v32 = vpack.c.bf16 %v463_v27, %v461_v22  ;;  %v914_v27 = vadd.f32 %v1808_v34, %v1814_v36 }
 0x198   : > { %1176 = vmatprep.subr.bf16.mxu1 %v1175_v32 }
 0x199   : > { %1178 = vmatpush1.bf16.msra.mxu1 %v1177_v28 }
 0x19c   : > { %676 = vmatmul.mubr.f32.vlgmr.msra.gmra.mrb[4].mxu0 %v1827_v46  ;;  %v905_v46 = vadd.f32 %v1791_v24, %v1797_v29 }
 0x19d   : > { %680 = vmatprep.mubr.f32.mxu0 %v1830_v47 }
 0x19e   : > { %906 = vadd.xlane.f32.xlu0 %v905_v46 }
 0x1a0   : > { %681 = vmatmul.mubr.f32.gmra.mrb[6].mxu0 %v1833_v48 }
 0x1a1   : > { %685 = vmatprep.mubr.f32.mxu0 %v1836_v49 }
 0x1a4   : > { %686 = vmatmul.mubr.f32.gmra.mrb[8].mxu0 %v1839_v50 }
 0x1a5   : > { %690 = vmatprep.mubr.f32.mxu0 %v1842_v51 }
 0x1a8   : > { %691 = vmatmul.mubr.f32.gmra.mrb[10].mxu0 %v1845_v52 }
 0x1a9   : > { %695 = vmatprep.mubr.f32.mxu0 %v610_v33 }
 0x1ac   : > { %696 = vmatmul.mubr.f32.gmra.mrb[12].mxu0 %v609_v37 }
 0x20b   : > { %v910_v0 = vpop.xlane.xlu1 %909 }
 0x20c   : > { %v918_v6 = vmul.f32 0.00390625, %v910_v0 }
 0x20e   : > { %v1884_v19 = vsub.f32 %v1800_v30, %v918_v6  ;;  %v1887_v20 = vsub.f32 %v1794_v25, %v918_v6  ;;  %v911_v30 = vadd.f32 %v1803_v31, %v1811_v35 }
 0x210   : > { %v931_v28 = vmul.f32 %v1884_v19, %v1884_v19  ;;  %v932_v25 = vmul.f32 %v1887_v20, %v1887_v20 }
 0x212   : > { %v940_v32 = vadd.f32 %v932_v25, %v931_v28 }
 0x22b   : > { %v907_v1 = vpop.xlane.xlu0 %906 }
 0x22c   : > { %v917_v7 = vmul.f32 0.00390625, %v907_v1 }
 0x22e   : > { %v1890_v21 = vsub.f32 %v1797_v29, %v917_v7  ;;  %v1893_v22 = vsub.f32 %v1791_v24, %v917_v7 }
 0x230   : > { %v929_v24 = vmul.f32 %v1890_v21, %v1890_v21  ;;  %v930_v29 = vmul.f32 %v1893_v22, %v1893_v22 }
 0x232   : > { %v937_v33 = vadd.f32 %v930_v29, %v929_v24 }
 0x26f   : > { %v677_v47 = vpop.f32.mrb[4].mxu0 }
 0x270   : > { %v679_v48 = vpop.f32.mrb[5].mxu0  ;;  %1141 = vmatmul.mubr.msk.f32.vlgmr.msra.gmra.mrb[4].mxu1 %vm701_vm2, %v677_v47 }
 0x271   : > { %787 = vmatprep.mubr.f32.mxu1 %v1493_v14 }
 0x273   : > { %v682_v49 = vpop.f32.mrb[6].mxu0 }
 0x274   : > { %v684_v50 = vpop.f32.mrb[7].mxu0  ;;  %1142 = vmatmul.mubr.msk.f32.gmra.mrb[6].mxu1 %vm701_vm2, %v682_v49 }
 0x275   : > { %793 = vmatprep.mubr.f32.mxu1 %v1493_v14 }
 0x277   : > { %v687_v51 = vpop.f32.mrb[8].mxu0 }
 0x278   : > { %v689_v52 = vpop.f32.mrb[9].mxu0  ;;  %1143 = vmatmul.mubr.msk.f32.gmra.mrb[8].mxu1 %vm701_vm2, %v687_v51 }
 0x279   : > { %799 = vmatprep.mubr.f32.mxu1 %v1493_v14 }
 0x27b   : > { %v692_v39 = vpop.f32.mrb[10].mxu0 }
 0x27c   : > { %v694_v40 = vpop.f32.mrb[11].mxu0  ;;  %1144 = vmatmul.mubr.msk.f32.gmra.mrb[10].mxu1 %vm701_vm2, %v692_v39 }
 0x27d   : > { %805 = vmatprep.mubr.f32.mxu1 %v1493_v14  ;;  %v817_v14 = vshrl.u32 %v816_v62, 7 }
 0x27f   : > { %v697_v41 = vpop.f32.mrb[12].mxu0  ;;  %v818_v63 = vsub.s32 0, %v817_v14 }
 0x280   : > { %v699_v42 = vpop.f32.mrb[13].mxu0  ;;  %1145 = vmatmul.mubr.msk.f32.gmra.mrb[12].mxu1 %vm701_vm2, %v697_v41 }
 0x343   : > { %v783_v43 = vpop.f32.mrb[4].mxu1 }
 0x344   : > { %v785_v44 = vpop.f32.mrb[5].mxu1 }
 0x347   : > { %v789_v45 = vpop.f32.mrb[6].mxu1 }
 0x348   : > { %v791_v53 = vpop.f32.mrb[7].mxu1 }
 0x34b   : > { %v795_v54 = vpop.f32.mrb[8].mxu1 }
 0x34c   : > { %v797_v55 = vpop.f32.mrb[9].mxu1 }
 0x34f   : > { %v801_v56 = vpop.f32.mrb[10].mxu1 }
 0x350   : > { %v803_v57 = vpop.f32.mrb[11].mxu1 }
 0x353   : > { %v807_v58 = vpop.f32.mrb[12].mxu1 }
 0x354   : > { %v812_v59 = vadd.f32 1e-08, %v807_v58  ;;  %v809_v60 = vpop.f32.mrb[13].mxu1 }
 0x355   : > { %v813_v61 = vadd.f32 1e-08, %v809_v60 }
 0x356   : > { %1270 = vrcp.f32 %v812_v59 }
 0x357   : > { %1272 = vrcp.f32 %v813_v61 }
 0x360   : > { %v1271_v2 = vpop.eup %1270 }
 0x361   : > { %v1273_v3 = vpop.eup %1272  ;;  %v819_v4 = vrot.slane %v1271_v2, %v818_v63 }
 0x362   : > { %v823_v5 = vrot.slane %v1273_v3, %v818_v63 }
 0x363   : > { %v828_v8 = vmul.f32 %v819_v4, %v795_v54  ;;  %v824_v9 = vmul.f32 %v819_v4, %v783_v43  ;;  %v830_v10 = vmul.f32 %v819_v4, %v801_v56  ;;  %v826_v11 = vmul.f32 %v819_v4, %v789_v45 }
 0x364   : > { %v829_v12 = vmul.f32 %v823_v5, %v797_v55  ;;  %v825_v13 = vmul.f32 %v823_v5, %v785_v44  ;;  %v831_v15 = vmul.f32 %v823_v5, %v803_v57  ;;  %v827_v16 = vmul.f32 %v823_v5, %v791_v53 }
 0x366   : > { %v838_v17 = vadd.f32 %v829_v12, %v828_v8  ;;  %v832_v18 = vadd.f32 %v825_v13, %v824_v9  ;;  %v841_v23 = vadd.f32 %v831_v15, %v830_v10  ;;  %v835_v26 = vadd.f32 %v827_v16, %v826_v11 }
 0x368   : > { %839 = vadd.xlane.f32.xlu1 %v838_v17  ;;  %833 = vadd.xlane.f32.xlu0 %v832_v18 }
 0x36c   : > { %842 = vadd.xlane.f32.xlu1 %v841_v23  ;;  %836 = vadd.xlane.f32.xlu0 %v835_v26 }
 0x370   : > { %915 = vadd.xlane.f32.xlu1 %v914_v27  ;;  %912 = vadd.xlane.f32.xlu0 %v911_v30 }
 0x374   : > { %941 = vadd.xlane.f32.xlu1 %v940_v32  ;;  %938 = vadd.xlane.f32.xlu0 %v937_v33 }
 0x3f5   : > { %v840_v37 = vpop.xlane.xlu1 %839  ;;  %v834_v38 = vpop.xlane.xlu0 %833 }
 0x3f6   : > { %v847_v46 = vmul.f32 0.00390625, %v840_v37  ;;  %v845_v47 = vmul.f32 0.00390625, %v834_v38 }
 0x3f8   : > { %v1907_v48 = vsub.f32 %v828_v8, %v847_v46  ;;  %v1909_v49 = vsub.f32 %v824_v9, %v845_v47  ;;  %v1911_v50 = vsub.f32 %v825_v13, %v845_v47  ;;  %v1913_v51 = vsub.f32 %v829_v12, %v847_v46 }
 0x3f9   : > { %v843_v52 = vpop.xlane.xlu1 %842  ;;  %v837_v39 = vpop.xlane.xlu0 %836 }
 0x3fa   : > { %v848_v40 = vmul.f32 0.00390625, %v843_v52  ;;  %v846_v41 = vmul.f32 0.00390625, %v837_v39  ;;  %v857_v42 = vmul.f32 %v1909_v49, %v1909_v49  ;;  %v858_v43 = vmul.f32 %v1911_v50, %v1911_v50 }
 0x3fb   : > { %v861_v53 = vmul.f32 %v1907_v48, %v1907_v48  ;;  %v862_v59 = vmul.f32 %v1913_v51, %v1913_v51 }
 0x3fc   : > { %v1919_v44 = vsub.f32 %v826_v11, %v846_v41  ;;  %v1921_v45 = vsub.f32 %v827_v16, %v846_v41  ;;  %v1925_v54 = vsub.f32 %v830_v10, %v848_v40  ;;  %v1927_v55 = vsub.f32 %v831_v15, %v848_v40 }
 0x3fd   : > { %v916_v56 = vpop.xlane.xlu1 %915  ;;  %v913_v57 = vpop.xlane.xlu0 %912  ;;  %v865_v58 = vadd.f32 %v858_v43, %v857_v42  ;;  %v871_v5 = vadd.f32 %v862_v59, %v861_v53 }
 0x3fe   : > { %v920_v60 = vmul.f32 0.00390625, %v916_v56  ;;  %v919_v61 = vmul.f32 0.00390625, %v913_v57  ;;  %v859_v62 = vmul.f32 %v1919_v44, %v1919_v44  ;;  %v860_v14 = vmul.f32 %v1921_v45, %v1921_v45 }
 0x3ff   : > { %866 = vadd.xlane.f32.xlu0 %v865_v58  ;;  %v863_v7 = vmul.f32 %v1925_v54, %v1925_v54 }
 0x400   : > { %v1936_v63 = vsub.f32 %v1814_v36, %v920_v60  ;;  %v1939_v0 = vsub.f32 %v1808_v34, %v920_v60  ;;  %v1942_v1 = vsub.f32 %v1811_v35, %v919_v61  ;;  %v1945_v2 = vsub.f32 %v1803_v31, %v919_v61 }
 0x401   : > { %v942_v3 = vpop.xlane.xlu1 %941  ;;  %v939_v4 = vpop.xlane.xlu0 %938  ;;  %v868_v6 = vadd.f32 %v860_v14, %v859_v62  ;;  %v864_v36 = vmul.f32 %v1927_v55, %v1927_v55 }
 0x402   : > { %v950_v8 = vmul.f32 0.00390625, %v942_v3  ;;  %v949_v9 = vmul.f32 0.00390625, %v939_v4  ;;  %v933_v34 = vmul.f32 %v1942_v1, %v1942_v1  ;;  %v934_v35 = vmul.f32 %v1945_v2, %v1945_v2 }
 0x403   : > { %872 = vadd.xlane.f32.xlu0 %v871_v5  ;;  %869 = vadd.xlane.f32.xlu1 %v868_v6  ;;  %v935_v31 = vmul.f32 %v1936_v63, %v1936_v63  ;;  %v936_v10 = vmul.f32 %v1939_v0, %v1939_v0  ;;  %v874_v15 = vadd.f32 %v864_v36, %v863_v7 }
 0x404   : > { %v954_v11 = vadd.f32 1e-05, %v950_v8  ;;  %v953_v12 = vadd.f32 1e-05, %v949_v9  ;;  %v943_v13 = vadd.f32 %v934_v35, %v933_v34 }
 0x405   : > { %v946_v16 = vadd.f32 %v936_v10, %v935_v31 }
 0x406   : > { %1274 = vrsqrt.f32 %v954_v11 }
 0x407   : > { %1276 = vrsqrt.f32 %v953_v12  ;;  %875 = vadd.xlane.f32.xlu1 %v874_v15  ;;  %944 = vadd.xlane.f32.xlu0 %v943_v13 }
 0x40b   : > { %947 = vadd.xlane.f32.xlu1 %v946_v16 }
 0x410   : > { %v1275_v17 = vpop.eup %1274 }
 0x411   : > { %v1277_v18 = vpop.eup %1276  ;;  %v963_v23 = vmul.f32 %v1275_v17, %v1884_v19  ;;  %v964_v26 = vmul.f32 %v1275_v17, %v1887_v20 }
 0x412   : > { %v961_v27 = vmul.f32 %v1277_v18, %v1890_v21  ;;  %v962_v30 = vmul.f32 %v1277_v18, %v1893_v22 }
 0x413   : > { %971 = vst [vmem:[%s1776_s18 + $0x50] sm:$0xff] %v963_v23  ;;  %972 = vst [vmem:[%s1776_s18 + $0x58] sm:$0xff] %v964_v26 }
 0x414   : > { %969 = vst [vmem:[%s1776_s18 + $0x40] sm:$0xff] %v961_v27  ;;  %970 = vst [vmem:[%s1776_s18 + $0x48] sm:$0xff] %v962_v30 }
 0x48c   : > { %v867_v28 = vpop.xlane.xlu0 %866 }
 0x48d   : > { %v877_v25 = vmul.f32 0.00390625, %v867_v28 }
 0x48f   : > { %v881_v24 = vadd.f32 1e-05, %v877_v25 }
 0x490   : > { %v870_v29 = vpop.xlane.xlu1 %869  ;;  %v873_v32 = vpop.xlane.xlu0 %872 }
 0x491   : > { %1278 = vrsqrt.f32 %v881_v24  ;;  %v878_v33 = vmul.f32 0.00390625, %v870_v29  ;;  %v879_v37 = vmul.f32 0.00390625, %v873_v32 }
 0x493   : > { %v882_v38 = vadd.f32 1e-05, %v878_v33  ;;  %v883_v19 = vadd.f32 1e-05, %v879_v37 }
 0x494   : > { %v876_v46 = vpop.xlane.xlu1 %875  ;;  %v945_v20 = vpop.xlane.xlu0 %944 }
 0x495   : > { %1280 = vrsqrt.f32 %v882_v38  ;;  %v880_v21 = vmul.f32 0.00390625, %v876_v46  ;;  %v951_v22 = vmul.f32 0.00390625, %v945_v20 }
 0x496   : > { %1282 = vrsqrt.f32 %v883_v19 }
 0x497   : > { %v884_v47 = vadd.f32 1e-05, %v880_v21  ;;  %v955_v52 = vadd.f32 1e-05, %v951_v22 }
 0x498   : > { %v948_v39 = vpop.xlane.xlu1 %947 }
 0x499   : > { %1284 = vrsqrt.f32 %v884_v47  ;;  %v952_v40 = vmul.f32 0.00390625, %v948_v39 }
 0x49a   : > { %1286 = vrsqrt.f32 %v955_v52 }
 0x49b   : > { %v1279_v41 = vpop.eup %1278  ;;  %v956_v42 = vadd.f32 1e-05, %v952_v40 }
 0x49c   : > { %v889_v43 = vmul.f32 %v1279_v41, %v1909_v49  ;;  %v890_v53 = vmul.f32 %v1279_v41, %v1911_v50 }
 0x49d   : > { %1288 = vrsqrt.f32 %v956_v42 }
 0x49e   : > { %897 = vst [vmem:[%s1776_s18] sm:$0xff] %v889_v43  ;;  %898 = vst [vmem:[%s1776_s18 + $0x8] sm:$0xff] %v890_v53 }
 0x49f   : > { %v1281_v56 = vpop.eup %1280 }
 0x4a0   : > { %v1283_v57 = vpop.eup %1282  ;;  %v891_v58 = vmul.f32 %v1281_v56, %v1919_v44  ;;  %v892_v59 = vmul.f32 %v1281_v56, %v1921_v45 }
 0x4a1   : > { %v893_v60 = vmul.f32 %v1283_v57, %v1907_v48  ;;  %v894_v61 = vmul.f32 %v1283_v57, %v1913_v51 }
 0x4a2   : > { %899 = vst [vmem:[%s1776_s18 + $0x10] sm:$0xff] %v891_v58  ;;  %900 = vst [vmem:[%s1776_s18 + $0x18] sm:$0xff] %v892_v59 }
 0x4a3   : > { %v1285_v49 = vpop.eup %1284  ;;  %901 = vst [vmem:[%s1776_s18 + $0x20] sm:$0xff] %v893_v60  ;;  %902 = vst [vmem:[%s1776_s18 + $0x28] sm:$0xff] %v894_v61 }
 0x4a4   : > { %v1287_v50 = vpop.eup %1286  ;;  %v895_v62 = vmul.f32 %v1285_v49, %v1925_v54  ;;  %v896_v44 = vmul.f32 %v1285_v49, %v1927_v55 }
 0x4a5   : > { %v965_v48 = vmul.f32 %v1287_v50, %v1942_v1  ;;  %v966_v51 = vmul.f32 %v1287_v50, %v1945_v2 }
 0x4a6   : > { %903 = vst [vmem:[%s1776_s18 + $0x30] sm:$0xff] %v895_v62  ;;  %904 = vst [vmem:[%s1776_s18 + $0x38] sm:$0xff] %v896_v44 }
 0x4a7   : > { %v1289_v45 = vpop.eup %1288  ;;  %973 = vst [vmem:[%s1776_s18 + $0x60] sm:$0xff] %v965_v48  ;;  %974 = vst [vmem:[%s1776_s18 + $0x68] sm:$0xff] %v966_v51 }
 0x4a8   : > { %v967_v54 = vmul.f32 %v1289_v45, %v1936_v63  ;;  %v968_v55 = vmul.f32 %v1289_v45, %v1939_v0 }
 0x4aa   : > { %975 = vst [vmem:[%s1776_s18 + $0x70] sm:$0xff] %v967_v54  ;;  %976 = vst [vmem:[%s1776_s18 + $0x78] sm:$0xff] %v968_v55 }
 0x4ab   : > { %1421 = shalt.err (!%p1418_p0)
}
 0x4ac   : > { %s1422_s24 = scalar_lea.hbm %s1992_s20, 2048  ;;  %s1426_s13 = scalar_lea.hbm %s2046_s4, 4096 }
 0x4ad   : > { %p1423_p13 = scmp.ne.s32.totalorder %s1992_s20, %s1422_s24  ;;  %p1427_p1 = scmp.lt.u32.totalorder %s1992_s20, %s2046_s4 }
 0x4ae   : > { %p1428_p2 = scmp.lt.u32.totalorder %s1426_s13, %s1422_s24  ;;  %p1430_p9 = scmp.lt.u32.totalorder %s1422_s24, %s1992_s20 }
 0x4af   : > { %p1424_p8 = pnand %p1423_p13, %p2091_p10 }
 0x4b0   : > { %p1429_p4 = por %p1428_p2, %p1427_p1 }
 0x4b1   : > { %p1425_p12 = pneg %p1424_p8 }
 0x4b2   : > { %p1431_p6 = por %p1430_p9, %p1429_p4 }
 0x4b4   : > { %p1432_p3 = pnand %p1431_p6, %p1425_p12 }
 0x4b6   : > { %1435 = shalt.err (!%p1432_p3)
}
 0x4b7   : > { %s1495_s15 = smov 256   ;;  %s1496_s23 = smov 16  }
 0x4b8   : > { %1189 = dma.vmem_to_hbm [thread:$0]  (%p2091_p10), %s1994_s19, 2048, %s1992_s20, %s978_s8, %s1495_s15, %s1495_s15, %s1496_s23  }
 0x4b9 PF: > { %s2092_s26 = sld [smem:[#allocation16_spill]]  ;;  %s2093_s7 = sld [smem:[#allocation20_spill]] }
 0x4ba   : > { %s2094_s12 = sld [smem:[#allocation17_spill]] }
 0x4bf   : > { %s1006_s6 = sand.u32 1, %s2092_s26   ;;  %p2095_p5 = scmp.ne.s32.totalorder %s2093_s7, 0 }
 0x4c0   : > { %p2096_p7 = scmp.ge.s32.totalorder %s2094_s12, 2  ;;  %s1007_s18 = scalar_lea.sflag [#allocation5], %s1006_s6 }
 0x4c2   : > { %p1206_p11 = pnand %p2096_p7, %p2095_p5 }
 0x4c4   : > { %1465 = dma.done.wait (!%p1206_p11), %s1007_s18, 2048  }
 0x4c5   : > { %1467 = vsyncadd (!%p1206_p11), %s1007_s18, 4294965248  ;;  %s2097_s18 = sld [smem:[#allocation18_spill]]  ;;  %s2098_s11 = sld [smem:[#allocation19_spill]] }
 0x4c6   : > { %s2099_s15 = smov %s1474_s16  ;;  %s2100_s16 = smov %s1478_s17 }
 0x4cb   : > { %p21_p0 = scmp.ge.s32.totalorder %s2097_s18, 4   ;;  %s2101_s17 = smov %s2098_s11 }
 0x4cd   :  { %23 = sbr.rel (!%p21_p0) target bundleno = 10 (0xa), region = 113 }
 0x4d4   :  { %1012 = vsyncpa [#allocation4], 1 }
 0x4d5   :  { %1014 = vsyncpa [#allocation4 + $0x1], 1 }
 0x4d6   :  { %1015 = vsyncpa [#allocation7], 1 }
 0x4d7   :  { %1017 = vsyncpa [#allocation7 + $0x1], 1 }
 0x4d8   :  { %1018 = vsyncpa [#allocation10], 1 }
 0x4d9   :  { %1019 = vsyncpa [#allocation5], 1 }
 0x4da   :  { %1021 = vsyncpa [#allocation5 + $0x1], 1 }

</bundles_post_ra>
